<compile_context>
chip_gen: v5e
topology: v5e:2x2
jax: 0.10.0
libtpu: 0.0.40
codegen_flags: <defaults>
</compile_context>

<pallas_src>
import jax
import jax.numpy as jnp
from jax.experimental import pallas as pl
from jax.experimental.pallas import tpu as pltpu

LANE = 128
MAX_BLOCK_B = 16384                 # max batch elements per grid step
VMEM_LIMIT_BYTES = 32 * 1024 * 1024  # headroom over v5e's 16 MiB scoped default


def _round_up(v, m):
    return ((v + m - 1) // m) * m


def _tensorcores_per_chip():
    """2 for v7x / megacore parts (parallel grid axes shard across TCs), else 1."""
    try:
        kind = jax.devices()[0].device_kind.lower()
    except Exception:
        return 1
    return 2 if any(t in kind for t in ("v7", "v5p", "v4")) else 1


def cmlp_kernel(x_ref,
                w1_ref, b1_ref,
                w2_ref, b2_ref,
                w3_ref, b3_ref,
                w4_ref, b4_ref,
                o_ref):
    """Fused 4-layer MLP head on batch-packed lanes.

    x_ref : (bm, 128) f32 — each row packs P = 128//D_in batch elements, their
            D_in features contiguous on the lane axis (natural row-major x view).
    w*_ref: bf16 block-diagonal weights (P copies of the per-example weight), so
            each layer is a single lane-dense bf16 MXU matmul in packed layout.
    b*_ref: (1, P*out) f32 lane-tiled biases.
    o_ref : (bm, P) f32 — packed sigmoid outputs (row r, lane a = batch r*P + a).
    """
    x = x_ref[...].astype(jnp.bfloat16)  # single VPU downcast; MXU runs native bf16

    # encoder: Linear -> ReLU -> Dropout(eval: identity) -> Linear -> ReLU
    h = jnp.dot(x, w1_ref[...], preferred_element_type=jnp.float32) + b1_ref[...]
    h = jnp.maximum(h, 0.0)
    h = jnp.dot(h.astype(jnp.bfloat16), w2_ref[...],
                preferred_element_type=jnp.float32) + b2_ref[...]
    h = jnp.maximum(h, 0.0)

    # classifier: Linear -> ReLU -> Linear -> Sigmoid
    h = jnp.dot(h.astype(jnp.bfloat16), w3_ref[...],
                preferred_element_type=jnp.float32) + b3_ref[...]
    h = jnp.maximum(h, 0.0)
    logits = jnp.dot(h.astype(jnp.bfloat16), w4_ref[...],
                     preferred_element_type=jnp.float32) + b4_ref[...]
    o_ref[...] = jax.nn.sigmoid(logits).astype(o_ref.dtype)


@jax.jit
def cmlp_forward(x, params):
    """x: (B, input_dim) float32 -> (B, 1) float32 (eval-mode forward)."""
    w1, b1, w2, b2, w3, b3, w4, b4 = params
    B, D_in = x.shape
    H = w1.shape[0]

    # Packed layout needs an integer number of batch rows per 128-lane vreg row.
    # TODO(synk): general D_in (not dividing 128) would need a feature-pad staging pass.
    assert D_in <= LANE and LANE % D_in == 0, "input_dim must divide 128"
    P = LANE // D_in  # batch elements per packed row

    # ---- x as lane-dense packed rows: (B, D_in) row-major -> (R, 128) ------------
    if B % P == 0:
        R = B // P
        x_packed = x.reshape(R, LANE)          # free reshape, no HBM staging pass
    else:
        B_al = _round_up(B, P)                 # rare ragged case: one small pad pass
        R = B_al // P
        x_packed = jnp.zeros((B_al, D_in), x.dtype).at[:B].set(x).reshape(R, LANE)

    # ---- tile selection (packed rows; 1 row = P batch elements) ------------------
    n_tc = _tensorcores_per_chip()
    max_bm = max(8, MAX_BLOCK_B // P)
    # Size the tile from a target step count so B is not over-padded, keep the grid
    # a multiple of the TensorCore count (even split on v7x, no forced split on 1-TC).
    n_steps = _round_up(max(n_tc, pl.cdiv(R, max_bm)), n_tc)
    bm = _round_up(pl.cdiv(R, n_steps), 8)     # sublane-aligned streaming M dim
    if bm >= R:
        bm = R                                 # one full block (block dims == array dims)
    grid = pl.cdiv(R, bm)

    # ---- block-diagonal packed weights (bf16) + lane-tiled biases (f32) -----------
    def bdiag(w):  # P copies of w on the diagonal
        return jnp.kron(jnp.eye(P, dtype=w.dtype), w).astype(jnp.bfloat16)

    w1b = bdiag(w1.T)        # (P*D_in, P*H) = (128, P*H)
    w2b = bdiag(w2.T)        # (P*H, P*H)
    w3b = bdiag(w3.T)        # (P*H, P*H)
    w4b = bdiag(w4.T)        # (P*H, P)
    b1b = jnp.tile(b1.astype(jnp.float32), P)[None, :]
    b2b = jnp.tile(b2.astype(jnp.float32), P)[None, :]
    b3b = jnp.tile(b3.astype(jnp.float32), P)[None, :]
    b4b = jnp.tile(b4.astype(jnp.float32), P)[None, :]

    full = lambda a: pl.BlockSpec(a.shape, lambda i: (0, 0))

    out_packed = pl.pallas_call(
        cmlp_kernel,
        out_shape=jax.ShapeDtypeStruct((R, P), jnp.float32),
        grid_spec=pltpu.PrefetchScalarGridSpec(
            num_scalar_prefetch=0,
            grid=(grid,),
            in_specs=[
                pl.BlockSpec((bm, LANE), lambda i: (i, 0)),   # packed x tile
                full(w1b), full(b1b),                          # layer 1
                full(w2b), full(b2b),                          # layer 2
                full(w3b), full(b3b),                          # layer 3
                full(w4b), full(b4b),                          # layer 4
            ],
            out_specs=pl.BlockSpec((bm, P), lambda i: (i, 0)),
        ),
        compiler_params=pltpu.CompilerParams(
            dimension_semantics=("parallel",),
            vmem_limit_bytes=VMEM_LIMIT_BYTES),
    )(x_packed, w1b, b1b, w2b, b2b, w3b, b3b, w4b, b4b)

    # Unpack: row r, lane a == batch index r*P + a (row-major), so a reshape suffices.
    return out_packed.reshape(R * P)[:B].reshape(B, 1)


def init_params(key, input_dim, hidden_dim):
    """PyTorch nn.Linear-style init: weights (out, in), biases (out,)."""
    def linear(k, fan_in, fan_out):
        kw, kb = jax.random.split(k)
        bound = 1.0 / jnp.sqrt(fan_in)
        w = jax.random.uniform(kw, (fan_out, fan_in), jnp.float32, -bound, bound)
        b = jax.random.uniform(kb, (fan_out,), jnp.float32, -bound, bound)
        return w, b

    k1, k2, k3, k4 = jax.random.split(key, 4)
    w1, b1 = linear(k1, input_dim, hidden_dim)
    w2, b2 = linear(k2, hidden_dim, hidden_dim)
    w3, b3 = linear(k3, hidden_dim, hidden_dim)
    w4, b4 = linear(k4, hidden_dim, 1)
    return (w1, b1, w2, b2, w3, b3, w4, b4)


def cmlp_reference(x, params):
    """Pure-JAX f32 reference of the PyTorch forward (eval mode)."""
    w1, b1, w2, b2, w3, b3, w4, b4 = params
    h = jnp.maximum(x @ w1.T + b1, 0.0)          # Dropout(0.1) eval = identity
    h = jnp.maximum(h @ w2.T + b2, 0.0)
    h = jnp.maximum(h @ w3.T + b3, 0.0)
    return jax.nn.sigmoid(h @ w4.T + b4)


if __name__ == "__main__":
    # Module asserts: hidden_dim < input_dim and hidden_dim // 2 <= 2 => hidden_dim <= 5.
    input_dim, hidden_dim = 16, 4
    batch = 8

    key = jax.random.PRNGKey(0)
    kx, kp = jax.random.split(key)
    x = jax.random.normal(kx, (batch, input_dim), jnp.float32)
    params = init_params(kp, input_dim, hidden_dim)

    out = jax.block_until_ready(cmlp_forward(x, params))
    ref = cmlp_reference(x, params)

    assert out.shape == (batch, 1), out.shape
    # bf16 MXU passes with f32 accumulation: compare against the f32 reference with a
    # tolerance that covers bf16 rounding through 4 tiny layers (precision knob).
    assert jnp.allclose(out, ref, atol=2e-2, rtol=0.0), (out, ref)

    print("KERNEL_OK")
</pallas_src>

<mosaic_0001>
module attributes {stable_mosaic.version = 11 : i64} {
  func.func @cmlp_kernel(%arg0: i32, %arg1: memref<1x128xf32, #tpu.memory_space<vmem>>, %arg2: memref<128x32xbf16, #tpu.memory_space<vmem>>, %arg3: memref<1x32xf32, #tpu.memory_space<vmem>>, %arg4: memref<32x32xbf16, #tpu.memory_space<vmem>>, %arg5: memref<1x32xf32, #tpu.memory_space<vmem>>, %arg6: memref<32x32xbf16, #tpu.memory_space<vmem>>, %arg7: memref<1x32xf32, #tpu.memory_space<vmem>>, %arg8: memref<32x8xbf16, #tpu.memory_space<vmem>>, %arg9: memref<1x8xf32, #tpu.memory_space<vmem>>, %arg10: memref<1x8xf32, #tpu.memory_space<vmem>>) attributes {dimension_semantics = [#tpu.dimension_semantics<parallel>], iteration_bounds = array<i64: 1>, scalar_prefetch = 0 : i64, scratch_operands = 0 : i64, tpu.core_type = #tpu.core_type<tc>, window_params = [{transform_indices = @transform_0, window_bounds = array<i64: 1, 128>}, {pipeline_mode = #tpu.pipeline_mode<synchronous>, transform_indices = @transform_1, window_bounds = array<i64: 128, 32>}, {pipeline_mode = #tpu.pipeline_mode<synchronous>, transform_indices = @transform_2, window_bounds = array<i64: 1, 32>}, {pipeline_mode = #tpu.pipeline_mode<synchronous>, transform_indices = @transform_3, window_bounds = array<i64: 32, 32>}, {pipeline_mode = #tpu.pipeline_mode<synchronous>, transform_indices = @transform_4, window_bounds = array<i64: 1, 32>}, {pipeline_mode = #tpu.pipeline_mode<synchronous>, transform_indices = @transform_5, window_bounds = array<i64: 32, 32>}, {pipeline_mode = #tpu.pipeline_mode<synchronous>, transform_indices = @transform_6, window_bounds = array<i64: 1, 32>}, {pipeline_mode = #tpu.pipeline_mode<synchronous>, transform_indices = @transform_7, window_bounds = array<i64: 32, 8>}, {pipeline_mode = #tpu.pipeline_mode<synchronous>, transform_indices = @transform_8, window_bounds = array<i64: 1, 8>}, {transform_indices = @transform_9, window_bounds = array<i64: 1, 8>}]} {
    %c0 = arith.constant 0 : index
    %c0_0 = arith.constant 0 : index
    %0 = vector.load %arg1[%c0, %c0_0] : memref<1x128xf32, #tpu.memory_space<vmem>>, vector<1x128xf32>
    %1 = arith.truncf %0 : vector<1x128xf32> to vector<1x128xbf16>
    %c0_1 = arith.constant 0 : index
    %c0_2 = arith.constant 0 : index
    %2 = vector.load %arg2[%c0_1, %c0_2] : memref<128x32xbf16, #tpu.memory_space<vmem>>, vector<128x32xbf16>
    %cst = arith.constant dense<0.000000e+00> : vector<1x32xf32>
    %3 = tpu.matmul %1, %2, %cst {dimension_numbers = #tpu.dot_dimension_numbers<[1], [0], [0], [1], [0, 0, 1, 1], [], []>} : vector<1x128xbf16>, vector<128x32xbf16>, vector<1x32xf32> -> vector<1x32xf32>
    %c0_3 = arith.constant 0 : index
    %c0_4 = arith.constant 0 : index
    %4 = vector.load %arg3[%c0_3, %c0_4] : memref<1x32xf32, #tpu.memory_space<vmem>>, vector<1x32xf32>
    %5 = arith.addf %3, %4 : vector<1x32xf32>
    %cst_5 = arith.constant 0.000000e+00 : f32
    %6 = vector.broadcast %cst_5 : f32 to vector<1x32xf32>
    %7 = arith.maximumf %5, %6 : vector<1x32xf32>
    %8 = arith.truncf %7 : vector<1x32xf32> to vector<1x32xbf16>
    %c0_6 = arith.constant 0 : index
    %c0_7 = arith.constant 0 : index
    %9 = vector.load %arg4[%c0_6, %c0_7] : memref<32x32xbf16, #tpu.memory_space<vmem>>, vector<32x32xbf16>
    %cst_8 = arith.constant dense<0.000000e+00> : vector<1x32xf32>
    %10 = tpu.matmul %8, %9, %cst_8 {dimension_numbers = #tpu.dot_dimension_numbers<[1], [0], [0], [1], [0, 0, 1, 1], [], []>} : vector<1x32xbf16>, vector<32x32xbf16>, vector<1x32xf32> -> vector<1x32xf32>
    %c0_9 = arith.constant 0 : index
    %c0_10 = arith.constant 0 : index
    %11 = vector.load %arg5[%c0_9, %c0_10] : memref<1x32xf32, #tpu.memory_space<vmem>>, vector<1x32xf32>
    %12 = arith.addf %10, %11 : vector<1x32xf32>
    %cst_11 = arith.constant 0.000000e+00 : f32
    %13 = vector.broadcast %cst_11 : f32 to vector<1x32xf32>
    %14 = arith.maximumf %12, %13 : vector<1x32xf32>
    %15 = arith.truncf %14 : vector<1x32xf32> to vector<1x32xbf16>
    %c0_12 = arith.constant 0 : index
    %c0_13 = arith.constant 0 : index
    %16 = vector.load %arg6[%c0_12, %c0_13] : memref<32x32xbf16, #tpu.memory_space<vmem>>, vector<32x32xbf16>
    %cst_14 = arith.constant dense<0.000000e+00> : vector<1x32xf32>
    %17 = tpu.matmul %15, %16, %cst_14 {dimension_numbers = #tpu.dot_dimension_numbers<[1], [0], [0], [1], [0, 0, 1, 1], [], []>} : vector<1x32xbf16>, vector<32x32xbf16>, vector<1x32xf32> -> vector<1x32xf32>
    %c0_15 = arith.constant 0 : index
    %c0_16 = arith.constant 0 : index
    %18 = vector.load %arg7[%c0_15, %c0_16] : memref<1x32xf32, #tpu.memory_space<vmem>>, vector<1x32xf32>
    %19 = arith.addf %17, %18 : vector<1x32xf32>
    %cst_17 = arith.constant 0.000000e+00 : f32
    %20 = vector.broadcast %cst_17 : f32 to vector<1x32xf32>
    %21 = arith.maximumf %19, %20 : vector<1x32xf32>
    %22 = arith.truncf %21 : vector<1x32xf32> to vector<1x32xbf16>
    %c0_18 = arith.constant 0 : index
    %c0_19 = arith.constant 0 : index
    %23 = vector.load %arg8[%c0_18, %c0_19] : memref<32x8xbf16, #tpu.memory_space<vmem>>, vector<32x8xbf16>
    %cst_20 = arith.constant dense<0.000000e+00> : vector<1x8xf32>
    %24 = tpu.matmul %22, %23, %cst_20 {dimension_numbers = #tpu.dot_dimension_numbers<[1], [0], [0], [1], [0, 0, 1, 1], [], []>} : vector<1x32xbf16>, vector<32x8xbf16>, vector<1x8xf32> -> vector<1x8xf32>
    %c0_21 = arith.constant 0 : index
    %c0_22 = arith.constant 0 : index
    %25 = vector.load %arg9[%c0_21, %c0_22] : memref<1x8xf32, #tpu.memory_space<vmem>>, vector<1x8xf32>
    %26 = arith.addf %24, %25 : vector<1x8xf32>
    %27 = arith.negf %26 : vector<1x8xf32>
    %28 = math.exp %27 : vector<1x8xf32>
    %cst_23 = arith.constant 1.000000e+00 : f32
    %29 = vector.broadcast %cst_23 : f32 to vector<1x8xf32>
    %30 = arith.addf %29, %28 : vector<1x8xf32>
    %31 = arith.divf %29, %30 : vector<1x8xf32>
    %c0_24 = arith.constant 0 : index
    %c0_25 = arith.constant 0 : index
    %32 = vector.load %arg10[%c0_24, %c0_25] : memref<1x8xf32, #tpu.memory_space<vmem>>, vector<1x8xf32>
    tpu.vector_store %arg10[%c0_24, %c0_25], %31 {strides = array<i32>} : memref<1x8xf32, #tpu.memory_space<vmem>>, vector<1x8xf32>,
    return
  }
  func.func @transform_0(%arg0: i32) -> (i32, i32) {
    %c0_i32 = arith.constant 0 : i32
    %c0_i32_0 = arith.constant 0 : i32
    return %arg0, %c0_i32 : i32, i32
  }
  func.func @transform_1(%arg0: i32) -> (i32, i32) {
    %c0_i32 = arith.constant 0 : i32
    %c0_i32_0 = arith.constant 0 : i32
    %c0_i32_1 = arith.constant 0 : i32
    return %c0_i32, %c0_i32_0 : i32, i32
  }
  func.func @transform_2(%arg0: i32) -> (i32, i32) {
    %c0_i32 = arith.constant 0 : i32
    %c0_i32_0 = arith.constant 0 : i32
    %c0_i32_1 = arith.constant 0 : i32
    return %c0_i32, %c0_i32_0 : i32, i32
  }
  func.func @transform_3(%arg0: i32) -> (i32, i32) {
    %c0_i32 = arith.constant 0 : i32
    %c0_i32_0 = arith.constant 0 : i32
    %c0_i32_1 = arith.constant 0 : i32
    return %c0_i32, %c0_i32_0 : i32, i32
  }
  func.func @transform_4(%arg0: i32) -> (i32, i32) {
    %c0_i32 = arith.constant 0 : i32
    %c0_i32_0 = arith.constant 0 : i32
    %c0_i32_1 = arith.constant 0 : i32
    return %c0_i32, %c0_i32_0 : i32, i32
  }
  func.func @transform_5(%arg0: i32) -> (i32, i32) {
    %c0_i32 = arith.constant 0 : i32
    %c0_i32_0 = arith.constant 0 : i32
    %c0_i32_1 = arith.constant 0 : i32
    return %c0_i32, %c0_i32_0 : i32, i32
  }
  func.func @transform_6(%arg0: i32) -> (i32, i32) {
    %c0_i32 = arith.constant 0 : i32
    %c0_i32_0 = arith.constant 0 : i32
    %c0_i32_1 = arith.constant 0 : i32
    return %c0_i32, %c0_i32_0 : i32, i32
  }
  func.func @transform_7(%arg0: i32) -> (i32, i32) {
    %c0_i32 = arith.constant 0 : i32
    %c0_i32_0 = arith.constant 0 : i32
    %c0_i32_1 = arith.constant 0 : i32
    return %c0_i32, %c0_i32_0 : i32, i32
  }
  func.func @transform_8(%arg0: i32) -> (i32, i32) {
    %c0_i32 = arith.constant 0 : i32
    %c0_i32_0 = arith.constant 0 : i32
    %c0_i32_1 = arith.constant 0 : i32
    return %c0_i32, %c0_i32_0 : i32, i32
  }
  func.func @transform_9(%arg0: i32) -> (i32, i32) {
    %c0_i32 = arith.constant 0 : i32
    %c0_i32_0 = arith.constant 0 : i32
    return %arg0, %c0_i32 : i32, i32
  }
}

</mosaic_0001>

<bundles_post_ra>
// kernel: tile.24
= control target key start
LH: loop header
LB: loop body
LE: loop exit
PB: predicated region body
PF: predicated region fallthrough
CT: control target
= control target key end

     0   :  { %s67_s10 = smov 28   ;;  %s68_s11 = smov 20   ;;  %vm3_vm0 = vcmask 31744   ;;  %vm9_vm1 = vcmask 261344   ;;  %vm15_vm2 = vcmask 228544   ;;  %vm21_vm3 = vcmask 195744   ;;  %s111_s0 = inlined_call_operand.vmem [shape: f32[8,4], index: 0, kind: input, shape index: {}]   ;;  %s112_s1 = inlined_call_operand.vmem [shape: f32[1,32], index: 1, kind: output, shape index: {}]  }
   0x1   :  { %v53_v0 = vld [vmem:[%s111_s0 + $0x7] sm:$0x1]   ;;  %v55_v1 = vld [vmem:[%s111_s0 + $0x5] sm:$0x1]   ;;  %v57_v2 = vld [vmem:[%s111_s0 + $0x3] sm:$0x1]  }
   0x2   :  { %7 = vrot.lane.b32.xlu0 %v53_v0, %s67_s10  ;;  %19 = vrot.lane.b32.xlu1 %v55_v1, %s68_s11  ;;  %s69_s14 = smov 12   ;;  %v54_v3 = vld [vmem:[%s111_s0 + $0x6] sm:$0x1]   ;;  %v56_v4 = vld [vmem:[%s111_s0 + $0x4] sm:$0x1]   ;;  %s70_s21 = smov 24  }
   0x3   :  { %31 = vrot.lane.b32.xlu2 %v57_v2, %s69_s14  ;;  %v58_v5 = vld [vmem:[%s111_s0 + $0x2] sm:$0x1]   ;;  %s71_s22 = smov 16   ;;  %s72_s23 = smov 8   ;;  %v59_v6 = vld [vmem:[%s111_s0 + $0x1] sm:$0x1]  }
   0x4   :  { %s73_s26 = smov 4   ;;  %v2_v7 = vld [vmem:[%s111_s0] sm:$0x1]   ;;  %vm27_vm4 = vcmask 162944   ;;  %vm33_vm5 = vcmask 130144   ;;  %vm39_vm6 = vcmask 97344  }
   0x5   :  { %4 = vst.msk [vmem:[#allocation0] sm:$0x1] %vm3_vm0, %v2_v7   ;;  %vm45_vm7 = vcmask 64544  }
   0xa   :  { %13 = vrot.lane.b32.xlu0 %v54_v3, %s70_s21  ;;  %25 = vrot.lane.b32.xlu1 %v56_v4, %s71_s22 }
   0xb   :  { %37 = vrot.lane.b32.xlu2 %v58_v5, %s72_s23 }
  0x12   :  { %43 = vrot.lane.b32.xlu0 %v59_v6, %s73_s26 }
  0x5d   :  { %v32_v8 = vpop.permute.xlu2 %31  }
  0x65   :  { %v38_v9 = vpop.permute.xlu2 %37  }
  0x74   :  { %v8_v10 = vpop.permute.xlu0 %7   ;;  %v20_v11 = vpop.permute.xlu1 %19  }
  0x75   :  { %10 = vst.msk [vmem:[#allocation0] sm:$0x1] %vm9_vm1, %v8_v10  }
  0x7c   :  { %v14_v12 = vpop.permute.xlu0 %13   ;;  %v26_v13 = vpop.permute.xlu1 %25  }
  0x7d   :  { %16 = vst.msk [vmem:[#allocation0] sm:$0x1] %vm15_vm2, %v14_v12  }
  0x7e   :  { %22 = vst.msk [vmem:[#allocation0] sm:$0x1] %vm21_vm3, %v20_v11  }
  0x7f   :  { %28 = vst.msk [vmem:[#allocation0] sm:$0x1] %vm27_vm4, %v26_v13  }
  0x80   :  { %34 = vst.msk [vmem:[#allocation0] sm:$0x1] %vm33_vm5, %v32_v8  }
  0x81   :  { %40 = vst.msk [vmem:[#allocation0] sm:$0x1] %vm39_vm6, %v38_v9  }
  0x84   :  { %v44_v14 = vpop.permute.xlu0 %43  }
  0x85   :  { %46 = vst.msk [vmem:[#allocation0] sm:$0x1] %vm45_vm7, %v44_v14  }
  0x8c   :  { %v49_v15 = vld [vmem:[#allocation0] sm:$0x1] }
  0x8d   :  { %52 = vst [vmem:[%s112_s1] sm:$0x1] %v49_v15 }

// kernel: cmlp_forward.1
= control target key start
LH: loop header
LB: loop body
LE: loop exit
PB: predicated region body
PF: predicated region fallthrough
CT: control target
= control target key end

     0   :  { %s476_s0 = inlined_call_operand.vmem [shape: f32[1,128], index: 0, kind: input, shape index: {}]   ;;  %s477_s1 = inlined_call_operand.vmem [shape: bf16[128,32], index: 1, kind: input, shape index: {}]   ;;  %s478_s2 = inlined_call_operand.vmem [shape: f32[1,32], index: 2, kind: input, shape index: {}]   ;;  %s479_s3 = inlined_call_operand.vmem [shape: bf16[32,32], index: 3, kind: input, shape index: {}]   ;;  %s480_s4 = inlined_call_operand.vmem [shape: f32[1,32], index: 4, kind: input, shape index: {}]   ;;  %s481_s5 = inlined_call_operand.vmem [shape: bf16[32,32], index: 5, kind: input, shape index: {}]   ;;  %s482_s6 = inlined_call_operand.vmem [shape: f32[1,32], index: 6, kind: input, shape index: {}]   ;;  %s483_s7 = inlined_call_operand.vmem [shape: bf16[32,8], index: 7, kind: input, shape index: {}]   ;;  %s484_s8 = inlined_call_operand.vmem [shape: f32[1,8], index: 8, kind: input, shape index: {}]   ;;  %s485_s9 = inlined_call_operand.hbm [shape: f32[1,8], index: 9, kind: output, shape index: {}]  }
   0x1   :  { %v324_v0 = vld [vmem:[%s477_s1 + $0x38] sm:$0xff]  ;;  %v323_v1 = vld [vmem:[%s477_s1 + $0x30] sm:$0xff] }
   0x2   :  { %101 = vmatpush.bf16.msra.mxu0 %v324_v0 }
   0x3   :  { %14 = vsyncpa [#allocation3], 0  ;;  %v322_v2 = vld [vmem:[%s477_s1 + $0x28] sm:$0xff]  ;;  %v321_v3 = vld [vmem:[%s477_s1 + $0x20] sm:$0xff]  ;;  %vm133_vm0 = vcmask 261120   ;;  %vm239_vm4 = vcmask 57344  }
   0x4   :  { %v320_v4 = vld [vmem:[%s477_s1 + $0x18] sm:$0xff]  ;;  %v319_v5 = vld [vmem:[%s477_s1 + $0x10] sm:$0xff]  ;;  %v318_v6 = vld [vmem:[%s477_s1 + $0x8] sm:$0xff] }
   0x5   :  { %v317_v7 = vld [vmem:[%s477_s1] sm:$0xff]  ;;  %v326_v10 = vld [vmem:[%s479_s3 + $0x8] sm:$0xff] }
   0x6   :  { %102 = vmatpush.bf16.msra.mxu0 %v323_v1  ;;  %v34_v8 = vld [vmem:[%s476_s0] sm:$0x1]  ;;  %143 = vmatpush.bf16.msra.mxu1 %v326_v10  ;;  %v328_v18 = vld [vmem:[%s481_s5 + $0x8] sm:$0xff] }
   0x7   :  { %v35_v9 = vpack.c.bf16 %v34_v8, %v34_v8  ;;  %v325_v11 = vld [vmem:[%s479_s3] sm:$0xff]  ;;  %178 = vmatpush.bf16.msra.mxu2 %v328_v18  ;;  %v330_v26 = vld [vmem:[%s483_s7 + $0x8] sm:$0xff] }
   0x8   :  { %v52_v12 = vld [vmem:[%s478_s2] sm:$0x1]  ;;  %213 = vmatpush.bf16.msra.mxu3 %v330_v26 }
   0x9   :  { %v327_v19 = vld [vmem:[%s481_s5] sm:$0xff] }
   0xa   :  { %103 = vmatpush.bf16.msra.mxu0 %v322_v2  ;;  %144 = vmatpush.bf16.msra.mxu1 %v325_v11  ;;  %v120_v20 = vld [vmem:[%s480_s4] sm:$0x1] }
   0xb   :  { %179 = vmatpush.bf16.msra.mxu2 %v327_v19  ;;  %v329_v27 = vld [vmem:[%s483_s7] sm:$0xff] }
   0xc   :  { %214 = vmatpush.bf16.msra.mxu3 %v329_v27  ;;  %v156_v28 = vld [vmem:[%s482_s6] sm:$0x1]  ;;  %s362_s6 = smov [#allocation2]  }
   0xd   :  { %v191_v34 = vld [vmem:[%s484_s8] sm:$0x1]  ;;  %s246_s7 = sshll.u32 %s362_s6, 4  ;;  %s248_s8 = sshll.u32 %s485_s9, 4  ;;  %s247_s7 = int_to_ptr.vmem [resolvable:$true] %s246_s7  ;;  %s249_s8 = int_to_ptr.hbm [resolvable:$true] %s248_s8 }
   0xe   :  { %104 = vmatpush.bf16.msra.mxu0 %v321_v3 }
  0x12   :  { %105 = vmatpush.bf16.msra.mxu0 %v320_v4 }
  0x16   :  { %106 = vmatpush.bf16.msra.mxu0 %v319_v5 }
  0x1a   :  { %107 = vmatpush.bf16.msra.mxu0 %v318_v6 }
  0x1e   :  { %108 = vmatpush.bf16.msra.mxu0 %v317_v7 }
  0x21   :  { %109 = vmatmul.bf16.vlgmr.msra.gmra.mxu0 %v35_v9 }
  0x9e   :  { %v110_v13 = vpop.f32.mrf.mxu0 }
  0x9f   :  { %v111_v14 = vadd.f32 %v110_v13, %v52_v12 }
  0xa1   :  { %v114_v15 = vmax.f32 %v111_v14, 0.0 }
  0xa3   :  { %v115_v16 = vpack.c.bf16 %v114_v15, %v114_v15 }
  0xa5   :  { %297 = vmatmul.msk.bf16.vlgmr.msra.gmra.mxu1 %vm133_vm0, %v115_v16 }
  0xa6   :  { %v112_v17 = vpop.f32.mrf.mxu0 }
 0x122   :  { %v146_v21 = vpop.f32.mrf.mxu1 }
 0x123   :  { %v147_v22 = vadd.f32 %v146_v21, %v120_v20 }
 0x125   :  { %v150_v23 = vmax.f32 %v147_v22, 0.0 }
 0x127   :  { %v151_v24 = vpack.c.bf16 %v150_v23, %v150_v23 }
 0x129   :  { %306 = vmatmul.msk.bf16.vlgmr.msra.gmra.mxu2 %vm133_vm0, %v151_v24 }
 0x12a   :  { %v148_v25 = vpop.f32.mrf.mxu1 }
 0x1ac   :  { %v181_v29 = vpop.f32.mrf.mxu2 }
 0x1ad   :  { %v182_v30 = vadd.f32 %v181_v29, %v156_v28 }
 0x1af   :  { %v185_v31 = vmax.f32 %v182_v30, 0.0 }
 0x1b1   :  { %v186_v32 = vpack.c.bf16 %v185_v31, %v185_v31 }
 0x1b3   :  { %315 = vmatmul.msk.bf16.vlgmr.msra.gmra.mxu3 %vm133_vm0, %v186_v32 }
 0x1b4   :  { %v183_v33 = vpop.f32.mrf.mxu2 }
 0x236   :  { %v216_v35 = vpop.f32.mrf.mxu3 }
 0x237   :  { %v217_v36 = vadd.f32 %v216_v35, %v191_v34 }
 0x239   :  { %v316_v37 = vmul.f32 -1.442695, %v217_v36 }
 0x23b   :  { %332 = vpow2.f32 %v316_v37 }
 0x23e   :  { %v218_v38 = vpop.f32.mrf.mxu3 }
 0x241   :  { %v333_v39 = vpop.eup %332 }
 0x242   :  { %v223_v40 = vadd.f32 1.0, %v333_v39 }
 0x244   :  { %334 = vrcp.f32 %v223_v40  ;;  %v235_v44 = vand.u32 2147483648, %v223_v40  ;;  %v233_v46 = vand.u32 2147483647, %v223_v40  ;;  %vm229_vm2 = vweird.f32 %v223_v40 }
 0x246   :  { %v236_v48 = vor.u32 1.1754944e-38, %v235_v44  ;;  %vm234_vm5 = vcmp.eq.f32.partialorder %v233_v46, 8.507059e+37 }
 0x24a   :  { %v335_v41 = vpop.eup %334 }
 0x24b   :  { %v225_v42 = vmul.f32 %v335_v41, %v223_v40  ;;  %vm230_vm1 = vweird.f32 %v335_v41 }
 0x24c   :  { %vm231_vm3 = vmor %vm229_vm2, %vm230_vm1 }
 0x24d   :  { %v226_v43 = vsub.f32 1.0, %v225_v42 }
 0x24f   :  { %v227_v45 = vmul.f32 %v335_v41, %v226_v43 }
 0x251   :  { %v228_v47 = vadd.f32 %v335_v41, %v227_v45 }
 0x253   :  { %v232_v49 = vsel %vm231_vm3, %v335_v41, %v228_v47 }
 0x254   :  { %v237_v50 = vsel %vm234_vm5, %v236_v48, %v232_v49 }
 0x255   :  { %240 = vst.msk [vmem:[#allocation2] sm:$0x1] %vm239_vm4, %v237_v50 }
 0x256   :  { %251 = dma.vmem_to_hbm [thread:$0]  %s247_s7, 16, %s249_s8, [#allocation3]  }
 0x257   :  { %360 = dma.done.wait [#allocation3], 16  }
 0x258   :  { %361 = vsyncadd [#allocation3], 4294967280 }
 0x259   :  { %256 = vsyncpa [#allocation3], 1 }

</bundles_post_ra>
